<compile_context>
chip_gen: v5e
topology: v5e:2x2
jax: 0.10.0
libtpu: 0.0.40
codegen_flags: <defaults>
</compile_context>

<pallas_src>
import jax
import jax.numpy as jnp
from jax.experimental import pallas as pl
from jax.experimental.pallas import tpu as pltpu


def _round_up(x, m):
    return ((x + m - 1) // m) * m


def _pad2(a, rows, cols):
    pr, pc = rows - a.shape[0], cols - a.shape[1]
    if pr == 0 and pc == 0:
        return a
    return jnp.pad(a, ((0, pr), (0, pc)))


def _device_vmem_cap_bytes():
    # 0.9x physical VMEM if the query is available; otherwise a value that is
    # safe on every generation (v7x has 64 MiB per TensorCore).
    try:
        return int(0.9 * pltpu.get_tpu_info().vmem_capacity_bytes)
    except Exception:
        return 64 * 1024 * 1024


def _pick_tk(F):
    # Largest divisor of F that is a multiple of 128 (lane-aligned K tile).
    for tk in (512, 384, 256, 128):
        if F % tk == 0:
            return tk
    return None


# ----------------------------------------------------------------------------
# Kernels
# ----------------------------------------------------------------------------
def _classifier_head_kernel(x_ref, w1_ref, b1_ref, w2_ref, b2_ref, o_ref):
    # x is read from HBM in its native dtype; cast to the MXU dtype in VMEM.
    x = x_ref[...].astype(w1_ref.dtype)
    h = jnp.dot(x, w1_ref[...], preferred_element_type=jnp.float32)
    # Bias + ReLU in f32 on the VPU (v5e VPU has no bf16 path).
    h = jnp.maximum(h + b1_ref[...], 0.0)
    # Dropout: eval-mode identity.
    out = jnp.dot(h.astype(w2_ref.dtype), w2_ref[...],
                  preferred_element_type=jnp.float32)
    o_ref[...] = (out + b2_ref[...]).astype(o_ref.dtype)


def _classifier_head_kernel_ktiled(x_ref, w1_ref, b1_ref, w2_ref, b2_ref,
                                   o_ref, h_acc):
    # W1 is streamed along the (last, "arbitrary") reduction grid axis; the
    # hidden activations are accumulated in f32 VMEM scratch.
    k = pl.program_id(1)

    @pl.when(k == 0)
    def _():
        h_acc[...] = jnp.zeros_like(h_acc)

    x = x_ref[...].astype(w1_ref.dtype)
    h_acc[...] += jnp.dot(x, w1_ref[...], preferred_element_type=jnp.float32)

    @pl.when(k == pl.num_programs(1) - 1)
    def _():
        h = jnp.maximum(h_acc[...] + b1_ref[...], 0.0)
        out = jnp.dot(h.astype(w2_ref.dtype), w2_ref[...],
                      preferred_element_type=jnp.float32)
        o_ref[...] = (out + b2_ref[...]).astype(o_ref.dtype)


# ----------------------------------------------------------------------------
# Wrapper
# ----------------------------------------------------------------------------
def prepare_classifier_head_params(w1, b1, w2, b2, *,
                                   compute_dtype=jnp.bfloat16):
    """Pad/cast Linear params ONCE (model-load time), not per forward call.

    w1: (F, H) (== PyTorch weight.T), b1: (H,)/(1,H), w2: (H, C), b2: (C,)/(1,C).
    The hidden dim is zero-padded to a multiple of 128 lanes; padding is exact
    (padded hidden units are relu(0)=0 and their W2 rows are zero).  The class
    dim is intentionally NOT padded so the output writeback stays tight.
    """
    F, H = w1.shape
    Hw, C = w2.shape
    assert Hw == H, "w1/w2 hidden dims disagree"
    Hpad = _round_up(H, 128)
    return dict(
        w1=_pad2(jnp.asarray(w1), F, Hpad).astype(compute_dtype),
        b1=_pad2(jnp.asarray(b1).reshape(1, H), 1, Hpad).astype(jnp.float32),
        w2=_pad2(jnp.asarray(w2), Hpad, C).astype(compute_dtype),
        b2=jnp.asarray(b2).reshape(1, C).astype(jnp.float32),
        F=F, H=H, Hpad=Hpad, C=C,
    )


def classifier_head_apply(params, x, *, block_b=None, tk=None):
    """x: (B, F) in its native dtype -> logits (B, C) in x.dtype."""
    B, F = x.shape
    assert F == params["F"], "feature dim mismatch"
    Hpad, C = params["Hpad"], params["C"]
    w1, b1, w2, b2 = params["w1"], params["b1"], params["w2"], params["b2"]
    out_dtype = x.dtype

    x_isz = jnp.dtype(x.dtype).itemsize
    w_isz = jnp.dtype(w1.dtype).itemsize
    o_isz = jnp.dtype(out_dtype).itemsize

    # Batch tile: one tile for small batches (grid overhead dominates);
    # otherwise ~4 MiB x tiles capped at 1024 rows so the "parallel" batch axis
    # pipelines DMA and shards across TensorCores.
    if block_b is None:
        if B <= 1024:
            block_b = B
        else:
            block_b = min(1024, max(128, ((4 << 20) // (F * x_isz)) // 8 * 8))
    block_b = int(block_b)
    if block_b >= B:
        block_b = B                      # full-dim block: legal for any B
    elif block_b % 8:
        block_b = min(B, _round_up(block_b, 8))
    grid_b = pl.cdiv(B, block_b)         # ragged last tile: padded reads,
                                         # masked writeback -> no batch pad.

    vmem_cap = _device_vmem_cap_bytes()
    resident_w_bytes = 2 * (F * Hpad + Hpad * C) * w_isz  # double-buffered
    if tk is None and resident_w_bytes > vmem_cap // 2:
        tk = _pick_tk(F)                 # stream W1 when it won't stay resident
    use_ktiled = tk is not None

    cost = pl.CostEstimate(
        flops=2 * B * (F * Hpad + Hpad * C),
        transcendentals=0,
        bytes_accessed=int(B * F * x_isz + (F * Hpad + Hpad * C) * w_isz
                           + (Hpad + C) * 4 + B * C * o_isz),
    )

    if not use_ktiled:
        est = (2 * block_b * F * x_isz            # x tiles (native dtype)
               + 2 * block_b * C * o_isz          # out tiles
               + resident_w_bytes                 # weights
               + 2 * (Hpad + C) * 4               # biases
               + block_b * (F + Hpad + C) * 4)    # in-kernel temporaries
        call = pl.pallas_call(
            _classifier_head_kernel,
            out_shape=jax.ShapeDtypeStruct((B, C), out_dtype),
            grid_spec=pltpu.PrefetchScalarGridSpec(
                num_scalar_prefetch=0,
                grid=(grid_b,),
                in_specs=[
                    pl.BlockSpec((block_b, F), lambda i: (i, 0)),   # x tile
                    pl.BlockSpec((F, Hpad), lambda i: (0, 0)),      # W1 (resident)
                    pl.BlockSpec((1, Hpad), lambda i: (0, 0)),      # b1
                    pl.BlockSpec((Hpad, C), lambda i: (0, 0)),      # W2 (resident)
                    pl.BlockSpec((1, C), lambda i: (0, 0)),         # b2
                ],
                out_specs=pl.BlockSpec((block_b, C), lambda i: (i, 0)),
            ),
            compiler_params=pltpu.CompilerParams(
                dimension_semantics=("parallel",),
                vmem_limit_bytes=int(min(vmem_cap, max(32 << 20, 2 * est))),
            ),
            cost_estimate=cost,
        )
        return call(x, w1, b1, w2, b2)

    # ---- K-tiled path: W1 streamed, hidden accumulated in VMEM scratch ----
    assert F % tk == 0, "K tile must divide the feature dim exactly"
    grid_k = F // tk
    est = (2 * block_b * tk * x_isz
           + 2 * block_b * C * o_isz
           + 2 * tk * Hpad * w_isz + 2 * Hpad * C * w_isz
           + 2 * (Hpad + C) * 4
           + block_b * Hpad * 4                    # h_acc scratch
           + block_b * (tk + Hpad + C) * 4)        # in-kernel temporaries
    call = pl.pallas_call(
        _classifier_head_kernel_ktiled,
        out_shape=jax.ShapeDtypeStruct((B, C), out_dtype),
        grid_spec=pltpu.PrefetchScalarGridSpec(
            num_scalar_prefetch=0,
            grid=(grid_b, grid_k),
            in_specs=[
                pl.BlockSpec((block_b, tk), lambda i, k: (i, k)),   # x tile
                pl.BlockSpec((tk, Hpad), lambda i, k: (k, 0)),      # W1 K-slab
                pl.BlockSpec((1, Hpad), lambda i, k: (0, 0)),       # b1
                pl.BlockSpec((Hpad, C), lambda i, k: (0, 0)),       # W2 (resident)
                pl.BlockSpec((1, C), lambda i, k: (0, 0)),          # b2
            ],
            out_specs=pl.BlockSpec((block_b, C), lambda i, k: (i, 0)),
            scratch_shapes=[pltpu.VMEM((block_b, Hpad), jnp.float32)],
        ),
        compiler_params=pltpu.CompilerParams(
            dimension_semantics=("parallel", "arbitrary"),
            vmem_limit_bytes=int(min(vmem_cap, max(32 << 20, 2 * est))),
        ),
        cost_estimate=cost,
    )
    return call(x, w1, b1, w2, b2)


def classifier_head(x, w1, b1, w2, b2, *, compute_dtype=jnp.bfloat16,
                    block_b=None, tk=None):
    """Convenience one-shot wrapper (prefer prepare + apply in real use)."""
    params = prepare_classifier_head_params(w1, b1, w2, b2,
                                            compute_dtype=compute_dtype)
    return classifier_head_apply(params, x, block_b=block_b, tk=tk)


def classifier_head_ref(x, w1, b1, w2, b2):
    h = jnp.maximum(x @ w1 + b1, 0.0)
    return h @ w2 + b2


if __name__ == "__main__":
    # Small, module-consistent shapes: ClassifierHead(num_features=256,
    # num_classes=16) -> hidden = 128.
    B = 64
    num_features = 256
    hidden = num_features // 2          # 128
    num_classes = 16

    key = jax.random.PRNGKey(0)
    kx, k1, kb1, k2, kb2 = jax.random.split(key, 5)

    x = jax.random.normal(kx, (B, num_features), dtype=jnp.float32)
    # Deterministic "Linear" params, stored as (in, out) = PyTorch W^T.
    w1 = jax.random.normal(k1, (num_features, hidden), dtype=jnp.float32) * 0.05
    b1 = jax.random.normal(kb1, (1, hidden), dtype=jnp.float32) * 0.05
    w2 = jax.random.normal(k2, (hidden, num_classes), dtype=jnp.float32) * 0.05
    b2 = jax.random.normal(kb2, (1, num_classes), dtype=jnp.float32) * 0.05

    ref = classifier_head_ref(x, w1, b1, w2, b2)

    # 1) Default optimized path: bf16 MXU inputs, f32 accumulation, grid=(1,).
    out_bf16 = jax.block_until_ready(classifier_head(x, w1, b1, w2, b2))
    assert out_bf16.shape == (B, num_classes)
    assert jnp.allclose(out_bf16, ref, atol=3e-2, rtol=3e-2)

    # 2) Full-precision params, prepared once and reused (hoisted pad/cast).
    params_f32 = prepare_classifier_head_params(
        w1, b1, w2, b2, compute_dtype=jnp.float32)
    out_f32 = jax.block_until_ready(classifier_head_apply(params_f32, x))
    assert jnp.allclose(out_f32, ref, atol=3e-2, rtol=3e-2)

    # 3) Batch-tiled path (grid_b=4): per-row math is identical, so it must
    #    agree with the single-tile run to float accuracy.
    out_tiled = jax.block_until_ready(
        classifier_head_apply(params_f32, x, block_b=16))
    assert jnp.allclose(out_tiled, out_f32, atol=1e-4, rtol=1e-4)

    # 4) Ragged batch (B=60, block_b=16): validates the no-pad path where the
    #    last tile's out-of-range rows are masked on writeback.
    out_ragged = jax.block_until_ready(
        classifier_head_apply(params_f32, x[:60], block_b=16))
    assert out_ragged.shape == (60, num_classes)
    assert jnp.allclose(out_ragged, out_f32[:60], atol=1e-4, rtol=1e-4)

    # 5) K-tiled reduction path (streams W1 in 128-wide slabs, accumulates the
    #    hidden activations in VMEM scratch) — the big-weight / v7x strategy.
    out_kt = jax.block_until_ready(
        classifier_head_apply(params_f32, x, tk=128))
    assert jnp.allclose(out_kt, out_f32, atol=1e-3, rtol=1e-3)

    print("KERNEL_OK")
</pallas_src>

<mosaic_0001>
module attributes {stable_mosaic.version = 11 : i64} {
  func.func @_classifier_head_kernel(%arg0: i32, %arg1: memref<64x256xf32, #tpu.memory_space<vmem>>, %arg2: memref<256x128xbf16, #tpu.memory_space<vmem>>, %arg3: memref<1x128xf32, #tpu.memory_space<vmem>>, %arg4: memref<128x16xbf16, #tpu.memory_space<vmem>>, %arg5: memref<1x16xf32, #tpu.memory_space<vmem>>, %arg6: memref<64x16xf32, #tpu.memory_space<vmem>>) attributes {dimension_semantics = [#tpu.dimension_semantics<parallel>], iteration_bounds = array<i64: 1>, scalar_prefetch = 0 : i64, scratch_operands = 0 : i64, tpu.core_type = #tpu.core_type<tc>, window_params = [{transform_indices = @transform_0, window_bounds = array<i64: 64, 256>}, {pipeline_mode = #tpu.pipeline_mode<synchronous>, transform_indices = @transform_1, window_bounds = array<i64: 256, 128>}, {pipeline_mode = #tpu.pipeline_mode<synchronous>, transform_indices = @transform_2, window_bounds = array<i64: 1, 128>}, {pipeline_mode = #tpu.pipeline_mode<synchronous>, transform_indices = @transform_3, window_bounds = array<i64: 128, 16>}, {pipeline_mode = #tpu.pipeline_mode<synchronous>, transform_indices = @transform_4, window_bounds = array<i64: 1, 16>}, {transform_indices = @transform_5, window_bounds = array<i64: 64, 16>}]} {
    %c0 = arith.constant 0 : index
    %c0_0 = arith.constant 0 : index
    %0 = vector.load %arg1[%c0, %c0_0] : memref<64x256xf32, #tpu.memory_space<vmem>>, vector<64x256xf32>
    %1 = arith.truncf %0 : vector<64x256xf32> to vector<64x256xbf16>
    %c0_1 = arith.constant 0 : index
    %c0_2 = arith.constant 0 : index
    %2 = vector.load %arg2[%c0_1, %c0_2] : memref<256x128xbf16, #tpu.memory_space<vmem>>, vector<256x128xbf16>
    %cst = arith.constant dense<0.000000e+00> : vector<64x128xf32>
    %3 = tpu.matmul %1, %2, %cst {dimension_numbers = #tpu.dot_dimension_numbers<[1], [0], [0], [1], [0, 0, 1, 1], [], []>} : vector<64x256xbf16>, vector<256x128xbf16>, vector<64x128xf32> -> vector<64x128xf32>
    %c0_3 = arith.constant 0 : index
    %c0_4 = arith.constant 0 : index
    %4 = vector.load %arg3[%c0_3, %c0_4] : memref<1x128xf32, #tpu.memory_space<vmem>>, vector<1x128xf32>
    %5 = vector.broadcast %4 : vector<1x128xf32> to vector<64x128xf32>
    %6 = arith.addf %3, %5 : vector<64x128xf32>
    %cst_5 = arith.constant 0.000000e+00 : f32
    %7 = vector.broadcast %cst_5 : f32 to vector<64x128xf32>
    %8 = arith.maximumf %6, %7 : vector<64x128xf32>
    %9 = arith.truncf %8 : vector<64x128xf32> to vector<64x128xbf16>
    %c0_6 = arith.constant 0 : index
    %c0_7 = arith.constant 0 : index
    %10 = vector.load %arg4[%c0_6, %c0_7] : memref<128x16xbf16, #tpu.memory_space<vmem>>, vector<128x16xbf16>
    %cst_8 = arith.constant dense<0.000000e+00> : vector<64x16xf32>
    %11 = tpu.matmul %9, %10, %cst_8 {dimension_numbers = #tpu.dot_dimension_numbers<[1], [0], [0], [1], [0, 0, 1, 1], [], []>} : vector<64x128xbf16>, vector<128x16xbf16>, vector<64x16xf32> -> vector<64x16xf32>
    %c0_9 = arith.constant 0 : index
    %c0_10 = arith.constant 0 : index
    %12 = vector.load %arg5[%c0_9, %c0_10] : memref<1x16xf32, #tpu.memory_space<vmem>>, vector<1x16xf32>
    %13 = vector.broadcast %12 : vector<1x16xf32> to vector<64x16xf32>
    %14 = arith.addf %11, %13 : vector<64x16xf32>
    %c0_11 = arith.constant 0 : index
    %c0_12 = arith.constant 0 : index
    %15 = vector.load %arg6[%c0_11, %c0_12] : memref<64x16xf32, #tpu.memory_space<vmem>>, vector<64x16xf32>
    tpu.vector_store %arg6[%c0_11, %c0_12], %14 {strides = array<i32>} : memref<64x16xf32, #tpu.memory_space<vmem>>, vector<64x16xf32>,
    return
  }
  func.func @transform_0(%arg0: i32) -> (i32, i32) {
    %c0_i32 = arith.constant 0 : i32
    %c0_i32_0 = arith.constant 0 : i32
    return %arg0, %c0_i32 : i32, i32
  }
  func.func @transform_1(%arg0: i32) -> (i32, i32) {
    %c0_i32 = arith.constant 0 : i32
    %c0_i32_0 = arith.constant 0 : i32
    %c0_i32_1 = arith.constant 0 : i32
    return %c0_i32, %c0_i32_0 : i32, i32
  }
  func.func @transform_2(%arg0: i32) -> (i32, i32) {
    %c0_i32 = arith.constant 0 : i32
    %c0_i32_0 = arith.constant 0 : i32
    %c0_i32_1 = arith.constant 0 : i32
    return %c0_i32, %c0_i32_0 : i32, i32
  }
  func.func @transform_3(%arg0: i32) -> (i32, i32) {
    %c0_i32 = arith.constant 0 : i32
    %c0_i32_0 = arith.constant 0 : i32
    %c0_i32_1 = arith.constant 0 : i32
    return %c0_i32, %c0_i32_0 : i32, i32
  }
  func.func @transform_4(%arg0: i32) -> (i32, i32) {
    %c0_i32 = arith.constant 0 : i32
    %c0_i32_0 = arith.constant 0 : i32
    %c0_i32_1 = arith.constant 0 : i32
    return %c0_i32, %c0_i32_0 : i32, i32
  }
  func.func @transform_5(%arg0: i32) -> (i32, i32) {
    %c0_i32 = arith.constant 0 : i32
    %c0_i32_0 = arith.constant 0 : i32
    return %arg0, %c0_i32 : i32, i32
  }
}

</mosaic_0001>

<bundles_post_ra>
// kernel: tpu_custom_call.1
= control target key start
LH: loop header
LB: loop body
LE: loop exit
PB: predicated region body
PF: predicated region fallthrough
CT: control target
= control target key end

     0   :  { %10 = vsyncpa [#allocation3], 0  ;;  %s682_s0 = inlined_call_operand.hbm [shape: f32[64,256], index: 0, kind: input, shape index: {}]   ;;  %s683_s1 = inlined_call_operand.hbm [shape: bf16[256,128], index: 1, kind: input, shape index: {}]   ;;  %s684_s2 = inlined_call_operand.vmem [shape: f32[1,128], index: 2, kind: input, shape index: {}]   ;;  %s685_s3 = inlined_call_operand.vmem [shape: bf16[128,16], index: 3, kind: input, shape index: {}]   ;;  %s686_s4 = inlined_call_operand.vmem [shape: f32[1,16], index: 4, kind: input, shape index: {}]   ;;  %s687_s5 = inlined_call_operand.vmem [shape: f32[64,16], index: 5, kind: output, shape index: {}]  }
   0x1   :  { %s16_s20 = sshll.u32 %s682_s0, 4  ;;  %s17_s20 = int_to_ptr.hbm [resolvable:$true] %s16_s20 }
   0x2   :  { %11 = vsyncpa [#allocation5], 0  ;;  %s578_s21 = smov [#allocation2]   ;;  %s29_s25 = sshll.u32 %s683_s1, 4  ;;  %s30_s25 = int_to_ptr.hbm [resolvable:$true] %s29_s25 }
   0x3   :  { %s18_s22 = sshll.u32 %s578_s21, 4  ;;  %s579_s26 = smov 256   ;;  %s19_s22 = int_to_ptr.vmem [resolvable:$true] %s18_s22 }
   0x4   :  { %s580_s27 = smov 16   ;;  %s581_s28 = smov [#allocation4]  }
   0x5   :  { %24 = dma.hbm_to_vmem [thread:$0]  %s17_s20, 2048, %s19_s22, [#allocation3], %s579_s26, %s579_s26, %s580_s27  }
   0x6   :  { %s31_s29 = sshll.u32 %s581_s28, 4  ;;  %s582_s30 = smov 64   ;;  %s32_s29 = int_to_ptr.vmem [resolvable:$true] %s31_s29 }
   0x7   :  { %s583_s6 = smov 4  }
   0x8   :  { %37 = dma.hbm_to_vmem [thread:$0]  %s30_s25, 2048, %s32_s29, [#allocation5], %s582_s30, %s582_s30, %s583_s6  }
   0x9   :  { %574 = dma.done.wait [#allocation3], 2048  }
   0xa   :  { %575 = vsyncadd [#allocation3], 4294965248 }
   0xb   :  { %576 = dma.done.wait [#allocation5], 2048  }
   0xc   :  { %577 = vsyncadd [#allocation5], 4294965248  ;;  %v493_v0 = vld [vmem:[#allocation4 + $0x38] sm:$0xff]  ;;  %v492_v2 = vld [vmem:[#allocation4 + $0x30] sm:$0xff]  ;;  %vm375_vm0 = vcmask 130048  }
   0xd   :  { %v501_v1 = vld [vmem:[#allocation4 + $0x78] sm:$0xff]  ;;  %208 = vmatpush.bf16.msra.mxu0 %v493_v0  ;;  %v500_v3 = vld [vmem:[#allocation4 + $0x70] sm:$0xff]  ;;  %510 = vmatpush.bf16.msra.mxu3 %v493_v0  ;;  %v491_v4 = vld [vmem:[#allocation4 + $0x28] sm:$0xff] }
   0xe   :  { %237 = vmatpush.bf16.msra.mxu1 %v501_v1  ;;  %v499_v5 = vld [vmem:[#allocation4 + $0x68] sm:$0xff]  ;;  %v490_v6 = vld [vmem:[#allocation4 + $0x20] sm:$0xff]  ;;  %v489_v8 = vld [vmem:[#allocation4 + $0x18] sm:$0xff] }
   0xf   :  { %v498_v7 = vld [vmem:[#allocation4 + $0x60] sm:$0xff]  ;;  %v497_v9 = vld [vmem:[#allocation4 + $0x58] sm:$0xff]  ;;  %v488_v10 = vld [vmem:[#allocation4 + $0x10] sm:$0xff] }
  0x10   :  { %v496_v11 = vld [vmem:[#allocation4 + $0x50] sm:$0xff]  ;;  %v487_v12 = vld [vmem:[#allocation4 + $0x8] sm:$0xff]  ;;  %v486_v14 = vld [vmem:[#allocation4] sm:$0xff] }
  0x11   :  { %209 = vmatpush.bf16.msra.mxu0 %v492_v2  ;;  %511 = vmatpush.bf16.msra.mxu3 %v492_v2  ;;  %v495_v13 = vld [vmem:[#allocation4 + $0x48] sm:$0xff]  ;;  %v494_v15 = vld [vmem:[#allocation4 + $0x40] sm:$0xff]  ;;  %v54_v17 = vld [vmem:[#allocation2 + $0x10] sm:$0xff] }
  0x12   :  { %238 = vmatpush.bf16.msra.mxu1 %v500_v3  ;;  %v52_v16 = vld [vmem:[#allocation2] sm:$0xff]  ;;  %v53_v18 = vld [vmem:[#allocation2 + $0x8] sm:$0xff]  ;;  %v55_v19 = vld [vmem:[#allocation2 + $0x18] sm:$0xff] }
  0x13   :  { %v56_v20 = vld [vmem:[#allocation2 + $0x20] sm:$0xff]  ;;  %v58_v21 = vld [vmem:[#allocation2 + $0x30] sm:$0xff]  ;;  %v68_v22 = vpack.c.bf16 %v54_v17, %v52_v16  ;;  %v69_v23 = vpack.c.bf16 %v55_v19, %v53_v18  ;;  %v57_v25 = vld [vmem:[#allocation2 + $0x28] sm:$0xff] }
  0x14   :  { %v70_v24 = vpack.c.bf16 %v58_v21, %v56_v20  ;;  %v59_v26 = vld [vmem:[#allocation2 + $0x38] sm:$0xff]  ;;  %v60_v27 = vld [vmem:[#allocation2 + $0x40] sm:$0xff]  ;;  %v62_v28 = vld [vmem:[#allocation2 + $0x50] sm:$0xff] }
  0x15   :  { %210 = vmatpush.bf16.msra.mxu0 %v491_v4  ;;  %512 = vmatpush.bf16.msra.mxu3 %v491_v4  ;;  %v71_v29 = vpack.c.bf16 %v59_v26, %v57_v25  ;;  %v72_v30 = vpack.c.bf16 %v62_v28, %v60_v27  ;;  %v509_v31 = vld [vmem:[%s685_s3 + $0x38] sm:$0xff]  ;;  %v508_v32 = vld [vmem:[%s685_s3 + $0x30] sm:$0xff]  ;;  %v507_v33 = vld [vmem:[%s685_s3 + $0x28] sm:$0xff] }
  0x16   :  { %239 = vmatpush.bf16.msra.mxu1 %v499_v5  ;;  %346 = vmatpush.bf16.msra.mxu2 %v509_v31  ;;  %v61_v34 = vld [vmem:[#allocation2 + $0x48] sm:$0xff]  ;;  %v63_v35 = vld [vmem:[#allocation2 + $0x58] sm:$0xff]  ;;  %v64_v36 = vld [vmem:[#allocation2 + $0x60] sm:$0xff] }
  0x17   :  { %v66_v37 = vld [vmem:[#allocation2 + $0x70] sm:$0xff]  ;;  %v506_v38 = vld [vmem:[%s685_s3 + $0x20] sm:$0xff]  ;;  %v73_v39 = vpack.c.bf16 %v63_v35, %v61_v34  ;;  %v65_v41 = vld [vmem:[#allocation2 + $0x68] sm:$0xff] }
  0x18   :  { %v74_v40 = vpack.c.bf16 %v66_v37, %v64_v36  ;;  %v67_v42 = vld [vmem:[#allocation2 + $0x78] sm:$0xff]  ;;  %v504_v45 = vld [vmem:[%s685_s3 + $0x10] sm:$0xff]  ;;  %v503_v46 = vld [vmem:[%s685_s3 + $0x8] sm:$0xff] }
  0x19   :  { %211 = vmatpush.bf16.msra.mxu0 %v490_v6  ;;  %513 = vmatpush.bf16.msra.mxu3 %v490_v6  ;;  %v75_v43 = vpack.c.bf16 %v67_v42, %v65_v41  ;;  %v505_v44 = vld [vmem:[%s685_s3 + $0x18] sm:$0xff]  ;;  %v502_v47 = vld [vmem:[%s685_s3] sm:$0xff] }
  0x1a   :  { %240 = vmatpush.bf16.msra.mxu1 %v498_v7  ;;  %347 = vmatpush.bf16.msra.mxu2 %v508_v32  ;;  %v524_v50 = vld [vmem:[%s684_s2] ss:$0 sm:$0xff] }
  0x1d   :  { %212 = vmatpush.bf16.msra.mxu0 %v489_v8  ;;  %514 = vmatpush.bf16.msra.mxu3 %v489_v8 }
  0x1e   :  { %241 = vmatpush.bf16.msra.mxu1 %v497_v9  ;;  %348 = vmatpush.bf16.msra.mxu2 %v507_v33 }
  0x21   :  { %213 = vmatpush.bf16.msra.mxu0 %v488_v10  ;;  %515 = vmatpush.bf16.msra.mxu3 %v488_v10 }
  0x22   :  { %242 = vmatpush.bf16.msra.mxu1 %v496_v11  ;;  %349 = vmatpush.bf16.msra.mxu2 %v506_v38 }
  0x25   :  { %214 = vmatpush.bf16.msra.mxu0 %v487_v12  ;;  %516 = vmatpush.bf16.msra.mxu3 %v487_v12 }
  0x26   :  { %243 = vmatpush.bf16.msra.mxu1 %v495_v13  ;;  %350 = vmatpush.bf16.msra.mxu2 %v505_v44 }
  0x29   :  { %215 = vmatpush.bf16.msra.mxu0 %v486_v14  ;;  %517 = vmatpush.bf16.msra.mxu3 %v486_v14 }
  0x2a   :  { %244 = vmatpush.bf16.msra.mxu1 %v494_v15  ;;  %351 = vmatpush.bf16.msra.mxu2 %v504_v45 }
  0x2c   :  { %216 = vmatmul.bf16.vlgmr.msra.gmra.mxu0 %v68_v22  ;;  %221 = vmatmul.bf16.vlgmr.msra.gmra.mxu3 %v70_v24 }
  0x2d   :  { %245 = vmatmul.bf16.vlgmr.msra.gmra.mxu1 %v69_v23 }
  0x2e   :  { %352 = vmatpush.bf16.msra.mxu2 %v503_v46 }
  0x32   :  { %353 = vmatpush.bf16.msra.mxu2 %v502_v47 }
  0x3c   :  { %226 = vmatmul.bf16.gmra.mxu3 %v72_v30 }
  0x3d   :  { %250 = vmatmul.bf16.gmra.mxu1 %v71_v29  ;;  %v525_v29 = vld [vmem:[%s686_s4] ss:$0 sm:$0xff] }
  0x4c   :  { %231 = vmatmul.bf16.gmra.mxu3 %v74_v40 }
  0x4d   :  { %255 = vmatmul.bf16.gmra.mxu1 %v73_v39 }
  0x5d   :  { %260 = vmatmul.bf16.gmra.mxu1 %v75_v43 }
  0xa9   :  { %v217_v48 = vpop.f32.mrf.mxu0 }
  0xaa   :  { %v246_v49 = vpop.f32.mrf.mxu1  ;;  %v218_v51 = vadd.f32 %v524_v50, %v217_v48 }
  0xac   :  { %v247_v55 = vadd.f32 %v246_v49, %v218_v51 }
  0xae   :  { %v266_v58 = vmax.f32 %v247_v55, 0.0 }
  0xaf   :  { %v222_v52 = vpop.f32.mrf.mxu3 }
  0xb0   :  { %v223_v63 = vadd.f32 %v524_v50, %v222_v52 }
  0xb1   :  { %v219_v53 = vpop.f32.mrf.mxu0 }
  0xb2   :  { %v248_v54 = vpop.f32.mrf.mxu1  ;;  %v220_v56 = vadd.f32 %v524_v50, %v219_v53 }
  0xb4   :  { %v249_v57 = vadd.f32 %v248_v54, %v220_v56 }
  0xb6   :  { %v267_v59 = vmax.f32 %v249_v57, 0.0 }
  0xb7   :  { %v224_v60 = vpop.f32.mrf.mxu3 }
  0xb8   :  { %v274_v61 = vpack.c.bf16 %v267_v59, %v266_v58  ;;  %v225_v0 = vadd.f32 %v524_v50, %v224_v60 }
  0xba   :  { %v251_v62 = vpop.f32.mrf.mxu1  ;;  %354 = vmatmul.bf16.vlgmr.msra.gmra.mxu2 %v274_v61 }
  0xbb   :  { %v252_v3 = vadd.f32 %v251_v62, %v223_v63 }
  0xbd   :  { %v268_v6 = vmax.f32 %v252_v3, 0.0 }
  0xbf   :  { %v227_v1 = vpop.f32.mrf.mxu3 }
  0xc0   :  { %v228_v10 = vadd.f32 %v524_v50, %v227_v1 }
  0xc2   :  { %v253_v2 = vpop.f32.mrf.mxu1 }
  0xc3   :  { %v254_v4 = vadd.f32 %v253_v2, %v225_v0 }
  0xc5   :  { %v269_v5 = vmax.f32 %v254_v4, 0.0 }
  0xc7   :  { %v275_v7 = vpack.c.bf16 %v269_v5, %v268_v6  ;;  %v229_v8 = vpop.f32.mrf.mxu3 }
  0xc8   :  { %v230_v11 = vadd.f32 %v524_v50, %v229_v8 }
  0xca   :  { %v256_v9 = vpop.f32.mrf.mxu1  ;;  %359 = vmatmul.bf16.gmra.mxu2 %v275_v7 }
  0xcb   :  { %v257_v13 = vadd.f32 %v256_v9, %v228_v10 }
  0xcd   :  { %v270_v17 = vmax.f32 %v257_v13, 0.0 }
  0xcf   :  { %v232_v15 = vpop.f32.mrf.mxu3 }
  0xd0   :  { %v233_v21 = vadd.f32 %v524_v50, %v232_v15 }
  0xd2   :  { %v258_v12 = vpop.f32.mrf.mxu1 }
  0xd3   :  { %v259_v14 = vadd.f32 %v258_v12, %v230_v11 }
  0xd5   :  { %v271_v16 = vmax.f32 %v259_v14, 0.0 }
  0xd7   :  { %v276_v18 = vpack.c.bf16 %v271_v16, %v270_v17  ;;  %v234_v20 = vpop.f32.mrf.mxu3 }
  0xd8   :  { %v235_v22 = vadd.f32 %v524_v50, %v234_v20 }
  0xda   :  { %v261_v19 = vpop.f32.mrf.mxu1  ;;  %364 = vmatmul.bf16.gmra.mxu2 %v276_v18 }
  0xdb   :  { %v262_v24 = vadd.f32 %v261_v19, %v233_v21 }
  0xdd   :  { %v272_v27 = vmax.f32 %v262_v24, 0.0 }
  0xe2   :  { %v263_v23 = vpop.f32.mrf.mxu1 }
  0xe3   :  { %v264_v25 = vadd.f32 %v263_v23, %v235_v22 }
  0xe5   :  { %v273_v26 = vmax.f32 %v264_v25, 0.0 }
  0xe7   :  { %v277_v28 = vpack.c.bf16 %v273_v26, %v272_v27 }
  0xea   :  { %369 = vmatmul.bf16.gmra.mxu2 %v277_v28 }
 0x13d   :  { %v355_v30 = vpop.f32.mrf.mxu2 }
 0x13e   :  { %v356_v31 = vadd.f32 %v525_v29, %v355_v30 }
 0x140   :  { %376 = vst.msk [vmem:[%s687_s5] sm:$0xff] %vm375_vm0, %v356_v31 }
 0x145   :  { %v357_v32 = vpop.f32.mrf.mxu2 }
 0x146   :  { %v358_v33 = vadd.f32 %v525_v29, %v357_v32 }
 0x148   :  { %377 = vst.msk [vmem:[%s687_s5 + $0x8] sm:$0xff] %vm375_vm0, %v358_v33 }
 0x14d   :  { %v360_v34 = vpop.f32.mrf.mxu2 }
 0x14e   :  { %v361_v35 = vadd.f32 %v525_v29, %v360_v34 }
 0x150   :  { %378 = vst.msk [vmem:[%s687_s5 + $0x10] sm:$0xff] %vm375_vm0, %v361_v35 }
 0x155   :  { %v362_v36 = vpop.f32.mrf.mxu2 }
 0x156   :  { %v363_v37 = vadd.f32 %v525_v29, %v362_v36 }
 0x158   :  { %379 = vst.msk [vmem:[%s687_s5 + $0x18] sm:$0xff] %vm375_vm0, %v363_v37 }
 0x15d   :  { %v365_v38 = vpop.f32.mrf.mxu2 }
 0x15e   :  { %v366_v39 = vadd.f32 %v525_v29, %v365_v38 }
 0x160   :  { %380 = vst.msk [vmem:[%s687_s5 + $0x20] sm:$0xff] %vm375_vm0, %v366_v39 }
 0x165   :  { %v367_v40 = vpop.f32.mrf.mxu2 }
 0x166   :  { %v368_v41 = vadd.f32 %v525_v29, %v367_v40 }
 0x168   :  { %381 = vst.msk [vmem:[%s687_s5 + $0x28] sm:$0xff] %vm375_vm0, %v368_v41 }
 0x16d   :  { %v370_v42 = vpop.f32.mrf.mxu2 }
 0x16e   :  { %v371_v43 = vadd.f32 %v525_v29, %v370_v42 }
 0x170   :  { %382 = vst.msk [vmem:[%s687_s5 + $0x30] sm:$0xff] %vm375_vm0, %v371_v43 }
 0x175   :  { %v372_v44 = vpop.f32.mrf.mxu2 }
 0x176   :  { %v373_v45 = vadd.f32 %v525_v29, %v372_v44 }
 0x178   :  { %383 = vst.msk [vmem:[%s687_s5 + $0x38] sm:$0xff] %vm375_vm0, %v373_v45 }
 0x179   :  { %388 = vsyncpa [#allocation3], 1 }
 0x17a   :  { %389 = vsyncpa [#allocation5], 1 }

</bundles_post_ra>
